<compile_context>
chip_gen: v7x
topology: tpu7x:2x2x1
jax: 0.10.0
libtpu: 0.0.40
codegen_flags: <defaults>
</compile_context>

<pallas_src>
import functools

import jax
import jax.numpy as jnp
from jax.experimental import pallas as pl
from jax.experimental.pallas import tpu as pltpu

_SUBLANE = 8
_TARGET_BLOCK_BYTES = 4 * 1024 * 1024      # ~4 MiB of input per grid step
_MAX_TILE_ROWS = 8192
_MIN_GRID_PROGRAMS = 2                     # keep both v7x TensorCores busy
_VMEM_HEADROOM_BYTES = 4 * 1024 * 1024     # margin for compiler scratch
_VMEM_CEILING_BYTES = 56 * 1024 * 1024     # stay under v7x's 64 MiB physical VMEM


def _round_up(x: int, m: int) -> int:
    return ((x + m - 1) // m) * m


def _choose_tile_rows(rows: int, features: int, itemsize: int) -> int:
    """Row tile sized for HBM bandwidth, VMEM budget, and multi-TC sharding."""
    rows8 = _round_up(rows, _SUBLANE)

    # Bandwidth target: ~4 MiB of input per step amortizes the ~0.35 us
    # per-grid-step overhead even at v7x's ~3.2 TB/s per-TC HBM bandwidth.
    tile = _TARGET_BLOCK_BYTES // max(1, features * itemsize)

    # VMEM pipeline budget per row: 2x double-buffered input + 2x output in
    # the I/O dtype, plus ~2 full-tile f32 working copies (x_f32 / diff).
    bytes_per_row = features * (4 * itemsize + 2 * 4)
    vmem_cap = (_VMEM_CEILING_BYTES - _VMEM_HEADROOM_BYTES) // max(1, bytes_per_row)
    # TODO(synk): if even 8 rows of a very wide F blow the budget, split the
    # feature axis / loop in-kernel instead of relying on one huge row.

    tile = min(tile, vmem_cap, _MAX_TILE_ROWS, rows8)

    # Keep at least _MIN_GRID_PROGRAMS programs on the parallel axis when the
    # row count permits, so v7x's two TensorCores both get work.
    if rows8 >= _MIN_GRID_PROGRAMS * _SUBLANE:
        tile = min(tile, _round_up(pl.cdiv(rows8, _MIN_GRID_PROGRAMS), _SUBLANE))

    tile = max(_SUBLANE, (tile // _SUBLANE) * _SUBLANE)
    return tile


def _vmem_limit_bytes(tile_rows: int, features: int, itemsize: int) -> int:
    """Scoped-VMEM limit derived from the chosen tile (+ headroom)."""
    io_bytes = 2 * 2 * tile_rows * features * itemsize   # 2x-buffered in + out
    tmp_bytes = 2 * tile_rows * features * 4              # f32 working copies
    param_bytes = 2 * 2 * features * 4                    # a_2 / b_2 blocks
    limit = io_bytes + tmp_bytes + param_bytes + _VMEM_HEADROOM_BYTES
    limit = max(limit, 16 * 1024 * 1024)
    return min(limit, _VMEM_CEILING_BYTES)


def _layernorm_kernel(x_ref, a_ref, b_ref, o_ref, *, eps: float):
    # x_ref: (tile_rows, F); a_ref / b_ref: (1, F); o_ref: (tile_rows, F)
    x = x_ref[...].astype(jnp.float32)
    n = x.shape[-1]
    mean = jnp.mean(x, axis=-1, keepdims=True)
    diff = x - mean
    # torch.std default: unbiased estimator (divide by N-1).
    # For n == 1 torch yields nan; reproduce that instead of crashing at trace.
    nm1 = n - 1
    inv_nm1 = (1.0 / nm1) if nm1 > 0 else float("nan")
    var = jnp.sum(diff * diff, axis=-1, keepdims=True) * inv_nm1
    std = jnp.sqrt(var)
    # Exact reciprocal; operand is only (tile, 1) so the divide is negligible.
    inv = pl.reciprocal(std + eps, approx=False)          # (tile, 1)
    a = a_ref[...].astype(jnp.float32)                    # (1, F)
    b = b_ref[...].astype(jnp.float32)                    # (1, F)
    # (diff * inv) * a + b: no full-tile `scale = a * inv` temporary.
    o_ref[...] = ((diff * inv) * a + b).astype(o_ref.dtype)


def layernorm(x: jax.Array, a_2: jax.Array, b_2: jax.Array,
              eps: float = 1e-6, tile_rows: int | None = None) -> jax.Array:
    """LayerNorm over the last axis of x. x: (..., features)."""
    orig_shape = x.shape
    features = orig_shape[-1]
    rows = 1
    for d in orig_shape[:-1]:
        rows *= d

    x2 = x.reshape(rows, features)
    a2 = a_2.reshape(1, features)
    b2 = b_2.reshape(1, features)

    if tile_rows is None:
        tile_rows = _choose_tile_rows(rows, features, x.dtype.itemsize)

    # Ragged last block is handled by Pallas (out-of-bounds writes masked,
    # out-of-bounds reads only feed discarded per-row results), so no padding
    # or trailing slice is needed.
    grid = (pl.cdiv(rows, tile_rows),)

    out = pl.pallas_call(
        functools.partial(_layernorm_kernel, eps=eps),
        out_shape=jax.ShapeDtypeStruct((rows, features), x.dtype),
        grid_spec=pltpu.PrefetchScalarGridSpec(
            num_scalar_prefetch=0,
            grid=grid,
            in_specs=[
                pl.BlockSpec((tile_rows, features), lambda i: (i, 0)),
                pl.BlockSpec((1, features), lambda i: (0, 0)),
                pl.BlockSpec((1, features), lambda i: (0, 0)),
            ],
            out_specs=pl.BlockSpec((tile_rows, features), lambda i: (i, 0)),
        ),
        compiler_params=pltpu.CompilerParams(
            dimension_semantics=("parallel",),
            vmem_limit_bytes=_vmem_limit_bytes(tile_rows, features,
                                               x.dtype.itemsize),
        ),
    )(x2, a2, b2)

    return out.reshape(orig_shape)


if __name__ == "__main__":
    key = jax.random.PRNGKey(0)

    # Lane-dense feature dim (multiple of 128) so output stores are unmasked.
    batch, seq, features = 2, 8, 128
    eps = 1e-6

    x = jax.random.normal(key, (batch, seq, features), dtype=jnp.float32)

    # Deterministic parameter init, matching the module's __init__:
    # a_2 = ones(features), b_2 = zeros(features)
    a_2 = jnp.ones((features,), dtype=jnp.float32)
    b_2 = jnp.zeros((features,), dtype=jnp.float32)

    out = layernorm(x, a_2, b_2, eps=eps)
    out = jax.block_until_ready(out)

    # Pure-JAX reference (same unbiased-std semantics as torch.std).
    mean = jnp.mean(x, axis=-1, keepdims=True)
    var = jnp.sum((x - mean) ** 2, axis=-1, keepdims=True) / (features - 1)
    std = jnp.sqrt(var)
    ref = a_2 * (x - mean) / (std + eps) + b_2

    assert out.shape == x.shape and out.dtype == x.dtype
    assert jnp.allclose(out, ref, atol=1e-5, rtol=1e-5)

    print("KERNEL_OK")
</pallas_src>

<mosaic_0001>
module attributes {stable_mosaic.version = 11 : i64} {
  func.func @_layernorm_kernel(%arg0: i32, %arg1: memref<8x128xf32, #tpu.memory_space<vmem>>, %arg2: memref<1x128xf32, #tpu.memory_space<vmem>>, %arg3: memref<1x128xf32, #tpu.memory_space<vmem>>, %arg4: memref<8x128xf32, #tpu.memory_space<vmem>>) attributes {dimension_semantics = [#tpu.dimension_semantics<parallel>], iteration_bounds = array<i64: 2>, scalar_prefetch = 0 : i64, scratch_operands = 0 : i64, tpu.core_type = #tpu.core_type<tc>, window_params = [{transform_indices = @transform_0, window_bounds = array<i64: 8, 128>}, {pipeline_mode = #tpu.pipeline_mode<synchronous>, transform_indices = @transform_1, window_bounds = array<i64: 1, 128>}, {pipeline_mode = #tpu.pipeline_mode<synchronous>, transform_indices = @transform_2, window_bounds = array<i64: 1, 128>}, {transform_indices = @transform_3, window_bounds = array<i64: 8, 128>}]} {
    %c0 = arith.constant 0 : index
    %c0_0 = arith.constant 0 : index
    %0 = vector.load %arg1[%c0, %c0_0] : memref<8x128xf32, #tpu.memory_space<vmem>>, vector<8x128xf32>
    %cst = arith.constant dense<0.000000e+00> : vector<8xf32>
    %1 = vector.multi_reduction <add>, %0, %cst [1] : vector<8x128xf32> to vector<8xf32>
    %2 = vector.shape_cast %1 : vector<8xf32> to vector<8x1xf32>
    %cst_1 = arith.constant 1.280000e+02 : f32
    %3 = vector.broadcast %cst_1 : f32 to vector<8x1xf32>
    %4 = arith.divf %2, %3 : vector<8x1xf32>
    %5 = vector.broadcast %4 : vector<8x1xf32> to vector<8x128xf32>
    %6 = arith.subf %0, %5 : vector<8x128xf32>
    %7 = arith.mulf %6, %6 : vector<8x128xf32>
    %cst_2 = arith.constant dense<0.000000e+00> : vector<8xf32>
    %8 = vector.multi_reduction <add>, %7, %cst_2 [1] : vector<8x128xf32> to vector<8xf32>
    %9 = vector.shape_cast %8 : vector<8xf32> to vector<8x1xf32>
    %cst_3 = arith.constant 0.00787401571 : f32
    %10 = vector.broadcast %cst_3 : f32 to vector<8x1xf32>
    %11 = arith.mulf %9, %10 : vector<8x1xf32>
    %12 = math.sqrt %11 : vector<8x1xf32>
    %cst_4 = arith.constant 9.99999997E-7 : f32
    %13 = vector.broadcast %cst_4 : f32 to vector<8x1xf32>
    %14 = arith.addf %12, %13 : vector<8x1xf32>
    %15 = tpu.reciprocal %14 : vector<8x1xf32> -> vector<8x1xf32>
    %c0_5 = arith.constant 0 : index
    %c0_6 = arith.constant 0 : index
    %16 = vector.load %arg2[%c0_5, %c0_6] : memref<1x128xf32, #tpu.memory_space<vmem>>, vector<1x128xf32>
    %c0_7 = arith.constant 0 : index
    %c0_8 = arith.constant 0 : index
    %17 = vector.load %arg3[%c0_7, %c0_8] : memref<1x128xf32, #tpu.memory_space<vmem>>, vector<1x128xf32>
    %18 = vector.broadcast %15 : vector<8x1xf32> to vector<8x128xf32>
    %19 = arith.mulf %6, %18 : vector<8x128xf32>
    %20 = vector.broadcast %16 : vector<1x128xf32> to vector<8x128xf32>
    %21 = arith.mulf %19, %20 : vector<8x128xf32>
    %22 = vector.broadcast %17 : vector<1x128xf32> to vector<8x128xf32>
    %23 = arith.addf %21, %22 : vector<8x128xf32>
    %c0_9 = arith.constant 0 : index
    %c0_10 = arith.constant 0 : index
    %24 = vector.load %arg4[%c0_9, %c0_10] : memref<8x128xf32, #tpu.memory_space<vmem>>, vector<8x128xf32>
    tpu.vector_store %arg4[%c0_9, %c0_10], %23 {strides = array<i32>} : memref<8x128xf32, #tpu.memory_space<vmem>>, vector<8x128xf32>,
    return
  }
  func.func @transform_0(%arg0: i32) -> (i32, i32) {
    %c0_i32 = arith.constant 0 : i32
    %c0_i32_0 = arith.constant 0 : i32
    return %arg0, %c0_i32 : i32, i32
  }
  func.func @transform_1(%arg0: i32) -> (i32, i32) {
    %c0_i32 = arith.constant 0 : i32
    %c0_i32_0 = arith.constant 0 : i32
    %c0_i32_1 = arith.constant 0 : i32
    return %c0_i32, %c0_i32_0 : i32, i32
  }
  func.func @transform_2(%arg0: i32) -> (i32, i32) {
    %c0_i32 = arith.constant 0 : i32
    %c0_i32_0 = arith.constant 0 : i32
    %c0_i32_1 = arith.constant 0 : i32
    return %c0_i32, %c0_i32_0 : i32, i32
  }
  func.func @transform_3(%arg0: i32) -> (i32, i32) {
    %c0_i32 = arith.constant 0 : i32
    %c0_i32_0 = arith.constant 0 : i32
    return %arg0, %c0_i32 : i32, i32
  }
}

</mosaic_0001>

<bundles_post_ra>
// kernel: tpu_custom_call.1
= control target key start
LH: loop header
LB: loop body
LE: loop exit
PB: predicated region body
PF: predicated region fallthrough
CT: control target
= control target key end

     0   :  { %8 = vsyncpa [#allocation3], 0  ;;  %s658_s0 = inlined_call_operand.hbm [shape: f32[16,128], index: 0, kind: input, shape index: {}]   ;;  %s659_s1 = inlined_call_operand.vmem [shape: f32[1,128], index: 1, kind: input, shape index: {}]   ;;  %s660_s2 = inlined_call_operand.vmem [shape: f32[1,128], index: 2, kind: input, shape index: {}]   ;;  %s661_s3 = inlined_call_operand.hbm [shape: f32[16,128], index: 3, kind: output, shape index: {}]  }
   0x1   :  { %10 = vsyncpa [#allocation3 + $0x1], 0 }
   0x2   :  { %11 = vsyncpa [#allocation4], 0 }
   0x3   :  { %13 = vsyncpa [#allocation4 + $0x1], 0  ;;  %s491_s12 = smov 0   ;;  %s493_s13 = smov 0  }
   0x4   :  { %s495_s14 = smov 0   ;;  %s497_s15 = smov 0  }
   0x5 LB: > { %s512_s16 = sadd.s32 4294967295, %s467_s15   ;;  %s307_s17 = sadd.s32 4294967294, %s467_s15   ;;  %s467_s15 = sphi %s497_s15, %s676_s15   ;;  %s463_s14 = sphi %s495_s14, %s675_s14   ;;  %s459_s13 = sphi %s493_s13, %s674_s13   ;;  %s455_s12 = sphi %s491_s12, %s673_s12  }
   0x6   : > { %s516_s18 = sadd.s32 1, %s467_s15   ;;  %s26_s19 = sadd.s32 1, %s463_s14 }
   0x7   : > { %s23_s20 = ssub.s32 %s467_s15, %s516_s18  ;;  %p33_p0 = scmp.ne.s32.totalorder %s463_s14, %s459_s13 }
   0x8   : > { %p24_p1 = scmp.eq.s32.totalorder %s23_s20, 0  ;;  %p34_p2 = scmp.eq.s32.totalorder %s467_s15, 0 }
   0x9   : > { %p39_p3 = scmp.ne.s32.totalorder %s459_s13, %s455_s12  ;;  %p40_p4 = scmp.eq.s32.totalorder %s512_s16, 0 }
   0xa   : > { %s528_s21 = scalar_select %p24_p1, %s463_s14, %s26_s19  }
   0xb   : > { %p530_p5 = por %p34_p2, %p33_p0  ;;  %p534_p6 = por %p40_p4, %p39_p3 }
   0xc   : > { %p105_p7 = scmp.eq.s32.totalorder %s512_s16, 1  ;;  %p111_p8 = scmp.eq.s32.totalorder %s307_s17, 1 }
   0xd   : > { %p333_p10 = scmp.lt.s32.totalorder %s467_s15, 2  ;;  %s137_s26 = sand.u32 1, %s463_s14  }
   0xe   : > { %p541_p11 = por %p105_p7, %p33_p0  ;;  %p545_p12 = por %p111_p8, %p39_p3 }
   0xf   : > { %s311_s27 = sshll.u32 %s467_s15, 7  ;;  %s310_s28 = sshll.u32 %s137_s26, 3 }
  0x10   : > { %s665_s24 = scalar_select %p541_p11, 1, 0 }
  0x11   : > { %s666_s25 = scalar_select %p545_p12, 1, 0 }
  0x12   : > { %s554_s4 = scalar_lea.hbm %s658_s0, %s311_s27  ;;  %s141_s5 = scalar_lea.vmem [#allocation2], %s310_s28 }
  0x13   : > { %s148_s6 = sshll.u32 %s141_s5, 4  ;;  %p558_p13 = pnand %p333_p10, %p530_p5  ;;  %s562_s6 = int_to_ptr.vmem [resolvable:$true] %s148_s6 }
  0x14   : > { %s138_s8 = scalar_lea.sflag [#allocation3], %s137_s26  ;;  %s371_s9 = scalar_lea.hbm %s554_s4, 128 }
  0x15   : > { %p372_p2 = scmp.ne.s32.totalorder %s554_s4, %s371_s9  ;;  %p373_p3 = pneg %p558_p13 }
  0x16   : > { %s376_s17 = scalar_lea.hbm %s658_s0, 256  ;;  %p377_p5 = scmp.lt.u32.totalorder %s554_s4, %s658_s0 }
  0x17   : > { %p374_p4 = pnand %p373_p3, %p372_p2  ;;  %p378_p8 = scmp.lt.u32.totalorder %s376_s17, %s371_s9 }
  0x18   : > { %p380_p9 = scmp.lt.u32.totalorder %s371_s9, %s554_s4 }
  0x19   : > { %p375_p7 = pneg %p374_p4  ;;  %p379_p10 = por %p378_p8, %p377_p5 }
  0x1b   : > { %p381_p0 = por %p380_p9, %p379_p10 }
  0x1d   : > { %p382_p1 = pnand %p381_p0, %p375_p7 }
  0x1f   : > { %385 = shalt.err (!%p382_p1)
}
  0x20   : > { %s386_s22 = scalar_lea.vmem %s562_s6, 128  ;;  %s469_s26 = smov [#allocation2]  }
  0x21   : > { %p387_p2 = scmp.ne.s32.totalorder %s562_s6, %s386_s22  ;;  %s391_s27 = sshll.u32 %s469_s26, 4  ;;  %s392_s27 = int_to_ptr.vmem [resolvable:$false] %s391_s27 }
  0x22   : > { %s393_s28 = scalar_lea.vmem %s392_s27, 256  ;;  %p394_p11 = scmp.lt.s32.totalorder %s562_s6, %s392_s27 }
  0x23   : > { %p389_p4 = pnand %p387_p2, %p373_p3  ;;  %p395_p5 = scmp.lt.s32.totalorder %s393_s28, %s386_s22 }
  0x25   : > { %p390_p12 = pneg %p389_p4  ;;  %p396_p8 = por %p395_p5, %p394_p11 }
  0x27   : > { %p397_p9 = pnand %p396_p8, %p390_p12 }
  0x29   : > { %400 = shalt.err (!%p397_p9)
}
  0x2a   : > { %328 = dma.hbm_to_vmem [thread:$0]  (!%p558_p13), %s554_s4, 128, %s562_s6, %s138_s8  }
  0x2b   : > { %p668_p0 = scmp.lt.s32.totalorder %s467_s15, 3  ;;  %p669_p1 = scmp.ge.s32.totalorder %s467_s15, 1 }
  0x2d   : > { %p154_p3 = pnand %p669_p1, %p668_p0 }
  0x2e   : > { %s596_s29 = sand.u32 (!%p154_p3), 1, %s459_s13  }
  0x2f   : > { %157 = sbr.rel (%p154_p3) target bundleno = 396 (0x18c), region = 32  ;;  %s313_s30 = sshll.u32 (!%p154_p3), %s596_s29, 3 }
  0x30   : > { %s160_s5 = scalar_lea.sflag (!%p154_p3), [#allocation3], %s596_s29  ;;  %s163_s9 = scalar_lea.vmem (!%p154_p3), [#allocation2], %s313_s30 }
  0x36   : > { %446 = dma.done.wait (%p534_p6), %s160_s5, 128  }
  0x37   : > { %448 = vsyncadd (%p534_p6), %s160_s5, 4294967168  ;;  %v186_v0 = vld [vmem:[%s163_s9] sm:$0xff]  ;;  %s318_s8 = sshll.u32 %s512_s16, 7  ;;  %s185_s10 = scalar_lea.vmem [#allocation5], %s313_s30 }
  0x38   : > { %187 = vadd.xlane.f32.xlu0 %v186_v0  ;;  %v315_v14 = vld [vmem:[%s659_s1] ss:$0 sm:$0xff]  ;;  %s237_s11 = sshll.u32 %s185_s10, 4  ;;  %s614_s20 = scalar_lea.hbm %s661_s3, %s318_s8  ;;  %s616_s11 = int_to_ptr.vmem [resolvable:$true] %s237_s11 }
  0x39   : > { %v316_v16 = vld [vmem:[%s660_s2] ss:$0 sm:$0xff]  ;;  %s224_s22 = scalar_lea.sflag [#allocation4], %s596_s29  ;;  %s401_s26 = scalar_lea.vmem %s616_s11, 128 }
  0x3a   : > { %p402_p6 = scmp.ne.s32.totalorder %s616_s11, %s401_s26  ;;  %p670_p11 = scmp.ne.s32.totalorder %s665_s24, 0 }
  0x3b   : > { %s470_s16 = smov [#allocation5]  }
  0x3c   : > { %p403_p12 = pnand %p402_p6, %p670_p11  ;;  %s405_s27 = sshll.u32 %s470_s16, 4  ;;  %s406_s27 = int_to_ptr.vmem [resolvable:$false] %s405_s27 }
  0x3d   : > { %s407_s28 = scalar_lea.vmem %s406_s27, 256  ;;  %p408_p7 = scmp.lt.s32.totalorder %s616_s11, %s406_s27 }
  0x3e   : > { %p404_p13 = pneg %p403_p12  ;;  %p409_p10 = scmp.lt.s32.totalorder %s407_s28, %s401_s26 }
  0x40   : > { %p410_p2 = por %p409_p10, %p408_p7 }
  0x42   : > { %p411_p4 = pnand %p410_p2, %p404_p13 }
  0xc5   : > { %v188_v1 = vpop.xlane.xlu0 %187 }
  0xc6   : > { %v190_v2 = vmul.f32 0.0078125, %v188_v1 }
  0xc8   : > { %v191_v3 = vsub.f32 %v186_v0, %v190_v2 }
  0xca   : > { %v192_v4 = vmul.f32 %v191_v3, %v191_v3 }
  0xcc   : > { %193 = vadd.xlane.f32.xlu0 %v192_v4 }
 0x159   : > { %v194_v5 = vpop.xlane.xlu0 %193 }
 0x15a   : > { %v195_v6 = vmul.f32 0.007874016, %v194_v5 }
 0x15c   : > { %367 = vrsqrt.f32 %v195_v6  ;;  %vm198_vm0 = vcmp.eq.f32.partialorder %v195_v6, inf  ;;  %v201_v9 = vand.u32 2147483648, %v195_v6  ;;  %vm200_vm1 = vcmp.eq.f32.partialorder %v195_v6, 0.0 }
 0x166   : > { %v368_v7 = vpop.eup %367 }
 0x167   : > { %v197_v8 = vmul.f32 %v368_v7, %v195_v6 }
 0x169   : > { %v199_v10 = vsel %vm198_vm0, %v195_v6, %v197_v8 }
 0x16a   : > { %v202_v11 = vsel %vm200_vm1, %v201_v9, %v199_v10 }
 0x16b   : > { %v203_v12 = vadd.f32 1e-06, %v202_v11 }
 0x16d   : > { %369 = vrcp.f32 %v203_v12 }
 0x177   : > { %v370_v13 = vpop.eup %369 }
 0x178   : > { %v207_v15 = vmul.f32 %v370_v13, %v191_v3 }
 0x17a   : > { %v214_v17 = vmul.f32 %v315_v14, %v207_v15 }
 0x17c   : > { %v221_v18 = vadd.f32 %v316_v16, %v214_v17 }
 0x17e   : > { %222 = vst [vmem:[%s185_s10] sm:$0xff] %v221_v18 }
 0x17f   : > { %414 = shalt.err (!%p411_p4)
}
 0x180   : > { %s415_s29 = scalar_lea.hbm %s614_s20, 128  ;;  %s419_s9 = scalar_lea.hbm %s661_s3, 256 }
 0x181   : > { %p416_p5 = scmp.ne.s32.totalorder %s614_s20, %s415_s29  ;;  %p420_p0 = scmp.lt.u32.totalorder %s614_s20, %s661_s3 }
 0x182   : > { %p421_p1 = scmp.lt.u32.totalorder %s419_s9, %s415_s29  ;;  %p423_p6 = scmp.lt.u32.totalorder %s415_s29, %s614_s20 }
 0x183   : > { %p417_p8 = pnand %p416_p5, %p670_p11 }
 0x184   : > { %p422_p3 = por %p421_p1, %p420_p0 }
 0x185   : > { %p418_p9 = pneg %p417_p8 }
 0x186   : > { %p424_p12 = por %p423_p6, %p422_p3 }
 0x188   : > { %p425_p13 = pnand %p424_p12, %p418_p9 }
 0x18a   : > { %428 = shalt.err (!%p425_p13)
}
 0x18b   : > { %323 = dma.vmem_to_hbm [thread:$0]  (%p670_p11), %s616_s11, 128, %s614_s20, %s224_s22  }
 0x18c PF: > { %s249_s6 = sand.u32 1, %s455_s12   ;;  %p671_p7 = scmp.ne.s32.totalorder %s666_s25, 0 }
 0x18d   : > { %p672_p10 = scmp.ge.s32.totalorder %s467_s15, 2  ;;  %s250_s7 = scalar_lea.sflag [#allocation4], %s249_s6 }
 0x18f   : > { %p330_p2 = pnand %p672_p10, %p671_p7 }
 0x191   : > { %450 = dma.done.wait (!%p330_p2), %s250_s7, 128  }
 0x192   : > { %452 = vsyncadd (!%p330_p2), %s250_s7, 4294967168  ;;  %p16_p4 = scmp.ge.s32.totalorder %s516_s18, 4   ;;  %s673_s12 = smov %s459_s13 }
 0x193   : > { %s674_s13 = smov %s463_s14  ;;  %s675_s14 = smov %s528_s21 }
 0x194   : > { %s676_s15 = smov %s516_s18  ;;  %18 = sbr.rel (!%p16_p4) target bundleno = 5 (0x5), region = 77 }
 0x19b   :  { %255 = vsyncpa [#allocation3], 1 }
 0x19c   :  { %257 = vsyncpa [#allocation3 + $0x1], 1 }
 0x19d   :  { %258 = vsyncpa [#allocation4], 1 }
 0x19e   :  { %260 = vsyncpa [#allocation4 + $0x1], 1 }

</bundles_post_ra>
